<compile_context>
chip_gen: v5e
topology: v5e:2x2
jax: 0.10.0
libtpu: 0.0.40
codegen_flags: <defaults>
</compile_context>

<pallas_src>
import functools
import math

import jax
import jax.numpy as jnp
from jax.experimental import pallas as pl
from jax.experimental.pallas import tpu as pltpu

M_MARGIN = 4            # self.m = 4 (phiflag=True path)
PI_CONST = 3.14159265   # literal used by the PyTorch module

# k = floor(m * acos(ct) / PI)  ==  #{ j in 1..m : ct <= cos(j*PI/m) }  (cos decreasing)
_COS_THRESH = tuple(math.cos(j * PI_CONST / M_MARGIN) for j in range(1, M_MARGIN + 1))


def angle_linear_kernel(x_ref, w_ref, cos_ref, phi_ref, xlen_ref, inv_xlen_ref,
                        *, mxu_dtype):
    # Row norms of x: compute once per batch tile (first class tile) and reuse.
    @pl.when(pl.program_id(1) == 0)
    def _():
        xf = x_ref[...].astype(jnp.float32)
        xsq = jnp.sum(xf * xf, axis=1, keepdims=True)            # (tm, 1)
        xlen_ref[...] = jnp.sqrt(xsq)
        inv_xlen_ref[...] = jax.lax.rsqrt(xsq)                   # EUP, no divide

    wf = w_ref[...].astype(jnp.float32)                          # (D, tn)
    # Per-column 1/||w_col||.  The renorm(2,1,1e-5).mul(1e5) scale cancels exactly in
    # cos_theta, so ww is never materialized and wlen never recomputed:
    #   cos_theta = (x @ w) / (||x|| * ||w_col||)
    inv_wnorm = jax.lax.rsqrt(jnp.sum(wf * wf, axis=0, keepdims=True))   # (1, tn)

    if mxu_dtype is not None:                                    # bf16-fed MXU path
        a = x_ref[...].astype(mxu_dtype)
        b = w_ref[...].astype(mxu_dtype)
    else:
        a = x_ref[...].astype(jnp.float32)
        b = wf
    ct = jnp.dot(a, b, preferred_element_type=jnp.float32)       # MXU, (tm, tn)
    ct = ct * inv_xlen_ref[...] * inv_wnorm                      # two muls, no divides
    ct = jnp.clip(ct, -1.0, 1.0)

    # cos(4*theta) via Chebyshev (mlambda[4]): 8 c^4 - 8 c^2 + 1
    c2 = ct * ct
    cos_m_theta = 8.0 * c2 * c2 - 8.0 * c2 + 1.0

    # k and (-1)^k from threshold compares (no acos / floor / mod).
    t1, t2, t3, t4 = _COS_THRESH
    b1, b2, b3, b4 = ct <= t1, ct <= t2, ct <= t3, ct <= t4
    k = (jnp.where(b1, 1.0, 0.0) + jnp.where(b2, 1.0, 0.0)
         + jnp.where(b3, 1.0, 0.0) + jnp.where(b4, 1.0, 0.0))
    parity = jnp.logical_xor(jnp.logical_xor(b1, b2), jnp.logical_xor(b3, b4))
    sign = jnp.where(parity, -1.0, 1.0)                          # (-1)^k
    phi = sign * cos_m_theta - 2.0 * k

    xlen = xlen_ref[...]
    cos_ref[...] = (ct * xlen).astype(cos_ref.dtype)
    phi_ref[...] = (phi * xlen).astype(phi_ref.dtype)


def _round_up(v, m):
    return (v + m - 1) // m * m


def angle_linear(x, weight, *, tm=128, tn=256, mxu_dtype=None,
                 vmem_limit_bytes=32 * 1024 * 1024):
    """cos_theta, phi_theta = AngleLinear(in_features, out_features, m=4).forward(x)."""
    B, D = x.shape
    Dw, N = weight.shape
    assert D == Dw
    # Lane-dense tiling: tn multiple of 128 (unmasked vector stores), tm multiple of 8.
    tm = min(tm, _round_up(B, 8))
    tn = min(tn, _round_up(N, 128))
    Bp, Np = _round_up(B, tm), _round_up(N, tn)
    if Bp != B:
        x = jnp.pad(x, ((0, Bp - B), (0, 0)))
    if Np != N:
        weight = jnp.pad(weight, ((0, 0), (0, Np - N)))
    # Padded rows/cols are all-zero -> their outputs are NaN (rsqrt(0)); they are
    # sliced off below and never mix with real rows/cols (all ops are elementwise
    # per row/column after the matmul).

    kernel = functools.partial(angle_linear_kernel, mxu_dtype=mxu_dtype)
    out_shape = (
        jax.ShapeDtypeStruct((Bp, Np), jnp.float32),
        jax.ShapeDtypeStruct((Bp, Np), jnp.float32),
    )
    cos_t, phi_t = pl.pallas_call(
        kernel,
        out_shape=out_shape,
        grid_spec=pltpu.PrefetchScalarGridSpec(
            num_scalar_prefetch=0,
            grid=(Bp // tm, Np // tn),
            in_specs=[
                pl.BlockSpec((tm, D), lambda i, j: (i, 0)),   # x tile (constant over j)
                pl.BlockSpec((D, tn), lambda i, j: (0, j)),   # weight tile
            ],
            out_specs=(
                pl.BlockSpec((tm, tn), lambda i, j: (i, j)),
                pl.BlockSpec((tm, tn), lambda i, j: (i, j)),
            ),
            scratch_shapes=[
                pltpu.VMEM((tm, 1), jnp.float32),   # ||x_row||
                pltpu.VMEM((tm, 1), jnp.float32),   # 1 / ||x_row||
            ],
        ),
        compiler_params=pltpu.CompilerParams(
            # Batch axis shardable across TensorCores; class axis kept sequential so
            # the per-row-norm scratch filled at j == 0 stays valid across class tiles.
            dimension_semantics=("parallel", "arbitrary"),
            vmem_limit_bytes=vmem_limit_bytes,
        ),
    )(x, weight)
    return cos_t[:B, :N], phi_t[:B, :N]


def init_weight(key, in_features, out_features):
    # Parameter(torch.Tensor(in, out)).uniform_(-1, 1).renorm_(2, 1, 1e-5).mul_(1e5)
    w = jax.random.uniform(key, (in_features, out_features),
                           dtype=jnp.float32, minval=-1.0, maxval=1.0)
    wnorm = jnp.sqrt(jnp.sum(w * w, axis=0, keepdims=True))
    scale = jnp.where(wnorm > 1e-5, 1e-5 / (wnorm + 1e-7), 1.0) * 1e5
    return w * scale


def angle_linear_ref(x, w):
    # Plain-JAX port of the PyTorch forward (phiflag=True, m=4) — source of truth.
    wnorm = jnp.sqrt(jnp.sum(w * w, axis=0, keepdims=True))
    ww = w * jnp.where(wnorm > 1e-5, 1e-5 / (wnorm + 1e-7), 1.0) * 1e5
    xlen = jnp.sqrt(jnp.sum(x * x, axis=1, keepdims=True))
    wlen = jnp.sqrt(jnp.sum(ww * ww, axis=0, keepdims=True))
    ct = jnp.clip(x @ ww / xlen / wlen, -1.0, 1.0)
    cmt = 8 * ct**4 - 8 * ct**2 + 1
    k = jnp.floor(M_MARGIN * jnp.arccos(ct) / PI_CONST)
    phi = jnp.where(jnp.mod(k, 2.0) == 0.0, 1.0, -1.0) * cmt - 2 * k
    return ct * xlen, phi * xlen


if __name__ == "__main__":
    key = jax.random.PRNGKey(0)
    k_x, k_w, k_x2, k_w2 = jax.random.split(key, 4)

    # Small check (single tile after padding N=16 -> 128).
    B, IN_F, OUT_F = 8, 32, 16
    x = jax.random.normal(k_x, (B, IN_F), dtype=jnp.float32)
    w = init_weight(k_w, IN_F, OUT_F)
    cos_t, phi_t = angle_linear(x, w)
    jax.block_until_ready((cos_t, phi_t))
    cos_r, phi_r = angle_linear_ref(x, w)
    assert cos_t.shape == (B, OUT_F) and phi_t.shape == (B, OUT_F)
    assert jnp.allclose(cos_t, cos_r, atol=5e-4, rtol=5e-4)
    assert jnp.allclose(phi_t, phi_r, atol=5e-4, rtol=5e-4)

    # Multi-tile check (multi-block grid after padding) exercising the pipelined path.
    B2, IN2, OUT2 = 200, 96, 300
    x2 = jax.random.normal(k_x2, (B2, IN2), dtype=jnp.float32)
    w2 = init_weight(k_w2, IN2, OUT2)
    cos2, phi2 = angle_linear(x2, w2)
    jax.block_until_ready((cos2, phi2))
    cos2_r, phi2_r = angle_linear_ref(x2, w2)
    assert cos2.shape == (B2, OUT2)
    assert jnp.allclose(cos2, cos2_r, atol=2e-3, rtol=2e-3)
    # phi uses threshold compares instead of acos/floor; values landing exactly on an
    # angular boundary (measure zero) may shift one margin step, so require that the
    # overwhelming majority match exactly.
    match = jnp.isclose(phi2, phi2_r, atol=2e-3, rtol=2e-3)
    assert float(jnp.mean(match.astype(jnp.float32))) > 0.999

    # bf16-fed MXU variant (v6e/v7x fast path); loose tolerance for bf16 operands.
    cos_bf, phi_bf = angle_linear(x2, w2, mxu_dtype=jnp.bfloat16)
    jax.block_until_ready((cos_bf, phi_bf))
    assert jnp.allclose(cos_bf, cos2_r, atol=0.15, rtol=0.15)

    print("KERNEL_OK")
</pallas_src>

<mosaic_0001>
module attributes {stable_mosaic.version = 11 : i64} {
  func.func @angle_linear_kernel(%arg0: i32, %arg1: i32, %arg2: memref<8x32xf32, #tpu.memory_space<vmem>>, %arg3: memref<32x128xf32, #tpu.memory_space<vmem>>, %arg4: memref<8x128xf32, #tpu.memory_space<vmem>>, %arg5: memref<8x128xf32, #tpu.memory_space<vmem>>, %arg6: memref<8x1xf32, #tpu.memory_space<vmem>>, %arg7: memref<8x1xf32, #tpu.memory_space<vmem>>) attributes {dimension_semantics = [#tpu.dimension_semantics<parallel>, #tpu.dimension_semantics<arbitrary>], iteration_bounds = array<i64: 1, 1>, scalar_prefetch = 0 : i64, scratch_operands = 2 : i64, tpu.core_type = #tpu.core_type<tc>, window_params = [{transform_indices = @transform_0, window_bounds = array<i64: 8, 32>}, {transform_indices = @transform_1, window_bounds = array<i64: 32, 128>}, {transform_indices = @transform_2, window_bounds = array<i64: 8, 128>}, {transform_indices = @transform_3, window_bounds = array<i64: 8, 128>}]} {
    %c0_i32 = arith.constant 0 : i32
    %0 = arith.cmpi eq, %arg1, %c0_i32 : i32
    %1 = arith.extui %0 : i1 to i32
    %c0_i32_0 = arith.constant 0 : i32
    %2 = arith.cmpi ne, %1, %c0_i32_0 : i32
    scf.if %2 {
      %c0_33 = arith.constant 0 : index
      %c0_34 = arith.constant 0 : index
      %68 = vector.load %arg2[%c0_33, %c0_34] : memref<8x32xf32, #tpu.memory_space<vmem>>, vector<8x32xf32>
      %69 = arith.mulf %68, %68 : vector<8x32xf32>
      %cst_35 = arith.constant dense<0.000000e+00> : vector<8xf32>
      %70 = vector.multi_reduction <add>, %69, %cst_35 [1] : vector<8x32xf32> to vector<8xf32>
      %71 = vector.shape_cast %70 : vector<8xf32> to vector<8x1xf32>
      %72 = math.sqrt %71 : vector<8x1xf32>
      %c0_36 = arith.constant 0 : index
      %c0_37 = arith.constant 0 : index
      %73 = vector.load %arg6[%c0_36, %c0_37] : memref<8x1xf32, #tpu.memory_space<vmem>>, vector<8x1xf32>
      tpu.vector_store %arg6[%c0_36, %c0_37], %72 {strides = array<i32>} : memref<8x1xf32, #tpu.memory_space<vmem>>, vector<8x1xf32>,
      %74 = math.rsqrt %71 : vector<8x1xf32>
      %c0_38 = arith.constant 0 : index
      %c0_39 = arith.constant 0 : index
      %75 = vector.load %arg7[%c0_38, %c0_39] : memref<8x1xf32, #tpu.memory_space<vmem>>, vector<8x1xf32>
      tpu.vector_store %arg7[%c0_38, %c0_39], %74 {strides = array<i32>} : memref<8x1xf32, #tpu.memory_space<vmem>>, vector<8x1xf32>,
    } else {
    }
    %c0 = arith.constant 0 : index
    %c0_1 = arith.constant 0 : index
    %3 = vector.load %arg3[%c0, %c0_1] : memref<32x128xf32, #tpu.memory_space<vmem>>, vector<32x128xf32>
    %4 = arith.mulf %3, %3 : vector<32x128xf32>
    %cst = arith.constant dense<0.000000e+00> : vector<128xf32>
    %5 = vector.multi_reduction <add>, %4, %cst [0] : vector<32x128xf32> to vector<128xf32>
    %6 = vector.shape_cast %5 : vector<128xf32> to vector<1x128xf32>
    %7 = math.rsqrt %6 : vector<1x128xf32>
    %c0_2 = arith.constant 0 : index
    %c0_3 = arith.constant 0 : index
    %8 = vector.load %arg2[%c0_2, %c0_3] : memref<8x32xf32, #tpu.memory_space<vmem>>, vector<8x32xf32>
    %cst_4 = arith.constant dense<0.000000e+00> : vector<8x128xf32>
    %9 = tpu.matmul %8, %3, %cst_4 {dimension_numbers = #tpu.dot_dimension_numbers<[1], [0], [0], [1], [0, 0, 1, 1], [], []>} : vector<8x32xf32>, vector<32x128xf32>, vector<8x128xf32> -> vector<8x128xf32>
    %c0_5 = arith.constant 0 : index
    %c0_6 = arith.constant 0 : index
    %10 = vector.load %arg7[%c0_5, %c0_6] : memref<8x1xf32, #tpu.memory_space<vmem>>, vector<8x1xf32>
    %11 = vector.broadcast %10 : vector<8x1xf32> to vector<8x128xf32>
    %12 = arith.mulf %9, %11 : vector<8x128xf32>
    %13 = vector.broadcast %7 : vector<1x128xf32> to vector<8x128xf32>
    %14 = arith.mulf %12, %13 : vector<8x128xf32>
    %cst_7 = arith.constant -1.000000e+00 : f32
    %cst_8 = arith.constant 1.000000e+00 : f32
    %15 = vector.broadcast %cst_7 : f32 to vector<8x128xf32>
    %16 = arith.maximumf %15, %14 : vector<8x128xf32>
    %17 = vector.broadcast %cst_8 : f32 to vector<8x128xf32>
    %18 = arith.minimumf %17, %16 : vector<8x128xf32>
    %19 = arith.mulf %18, %18 : vector<8x128xf32>
    %cst_9 = arith.constant 8.000000e+00 : f32
    %20 = vector.broadcast %cst_9 : f32 to vector<8x128xf32>
    %21 = arith.mulf %20, %19 : vector<8x128xf32>
    %22 = arith.mulf %21, %19 : vector<8x128xf32>
    %cst_10 = arith.constant 8.000000e+00 : f32
    %23 = vector.broadcast %cst_10 : f32 to vector<8x128xf32>
    %24 = arith.mulf %23, %19 : vector<8x128xf32>
    %25 = arith.subf %22, %24 : vector<8x128xf32>
    %cst_11 = arith.constant 1.000000e+00 : f32
    %26 = vector.broadcast %cst_11 : f32 to vector<8x128xf32>
    %27 = arith.addf %25, %26 : vector<8x128xf32>
    %cst_12 = arith.constant 0.707106769 : f32
    %28 = vector.broadcast %cst_12 : f32 to vector<8x128xf32>
    %29 = arith.cmpf ole, %18, %28 : vector<8x128xf32>
    %cst_13 = arith.constant 1.79489656E-9 : f32
    %30 = vector.broadcast %cst_13 : f32 to vector<8x128xf32>
    %31 = arith.cmpf ole, %18, %30 : vector<8x128xf32>
    %cst_14 = arith.constant -0.707106769 : f32
    %32 = vector.broadcast %cst_14 : f32 to vector<8x128xf32>
    %33 = arith.cmpf ole, %18, %32 : vector<8x128xf32>
    %cst_15 = arith.constant -1.000000e+00 : f32
    %34 = vector.broadcast %cst_15 : f32 to vector<8x128xf32>
    %35 = arith.cmpf ole, %18, %34 : vector<8x128xf32>
    %cst_16 = arith.constant 1.000000e+00 : f32
    %cst_17 = arith.constant 0.000000e+00 : f32
    %36 = vector.broadcast %cst_16 : f32 to vector<8x128xf32>
    %37 = vector.broadcast %cst_17 : f32 to vector<8x128xf32>
    %38 = arith.select %29, %36, %37 : vector<8x128xi1>, vector<8x128xf32>
    %cst_18 = arith.constant 1.000000e+00 : f32
    %cst_19 = arith.constant 0.000000e+00 : f32
    %39 = vector.broadcast %cst_18 : f32 to vector<8x128xf32>
    %40 = vector.broadcast %cst_19 : f32 to vector<8x128xf32>
    %41 = arith.select %31, %39, %40 : vector<8x128xi1>, vector<8x128xf32>
    %42 = arith.addf %38, %41 : vector<8x128xf32>
    %cst_20 = arith.constant 1.000000e+00 : f32
    %cst_21 = arith.constant 0.000000e+00 : f32
    %43 = vector.broadcast %cst_20 : f32 to vector<8x128xf32>
    %44 = vector.broadcast %cst_21 : f32 to vector<8x128xf32>
    %45 = arith.select %33, %43, %44 : vector<8x128xi1>, vector<8x128xf32>
    %46 = arith.addf %42, %45 : vector<8x128xf32>
    %cst_22 = arith.constant 1.000000e+00 : f32
    %cst_23 = arith.constant 0.000000e+00 : f32
    %47 = vector.broadcast %cst_22 : f32 to vector<8x128xf32>
    %48 = vector.broadcast %cst_23 : f32 to vector<8x128xf32>
    %49 = arith.select %35, %47, %48 : vector<8x128xi1>, vector<8x128xf32>
    %50 = arith.addf %46, %49 : vector<8x128xf32>
    %51 = arith.xori %29, %31 : vector<8x128xi1>
    %52 = arith.xori %33, %35 : vector<8x128xi1>
    %53 = arith.xori %51, %52 : vector<8x128xi1>
    %cst_24 = arith.constant -1.000000e+00 : f32
    %cst_25 = arith.constant 1.000000e+00 : f32
    %54 = vector.broadcast %cst_24 : f32 to vector<8x128xf32>
    %55 = vector.broadcast %cst_25 : f32 to vector<8x128xf32>
    %56 = arith.select %53, %54, %55 : vector<8x128xi1>, vector<8x128xf32>
    %57 = arith.mulf %56, %27 : vector<8x128xf32>
    %cst_26 = arith.constant 2.000000e+00 : f32
    %58 = vector.broadcast %cst_26 : f32 to vector<8x128xf32>
    %59 = arith.mulf %58, %50 : vector<8x128xf32>
    %60 = arith.subf %57, %59 : vector<8x128xf32>
    %c0_27 = arith.constant 0 : index
    %c0_28 = arith.constant 0 : index
    %61 = vector.load %arg6[%c0_27, %c0_28] : memref<8x1xf32, #tpu.memory_space<vmem>>, vector<8x1xf32>
    %62 = vector.broadcast %61 : vector<8x1xf32> to vector<8x128xf32>
    %63 = arith.mulf %18, %62 : vector<8x128xf32>
    %c0_29 = arith.constant 0 : index
    %c0_30 = arith.constant 0 : index
    %64 = vector.load %arg4[%c0_29, %c0_30] : memref<8x128xf32, #tpu.memory_space<vmem>>, vector<8x128xf32>
    tpu.vector_store %arg4[%c0_29, %c0_30], %63 {strides = array<i32>} : memref<8x128xf32, #tpu.memory_space<vmem>>, vector<8x128xf32>,
    %65 = vector.broadcast %61 : vector<8x1xf32> to vector<8x128xf32>
    %66 = arith.mulf %60, %65 : vector<8x128xf32>
    %c0_31 = arith.constant 0 : index
    %c0_32 = arith.constant 0 : index
    %67 = vector.load %arg5[%c0_31, %c0_32] : memref<8x128xf32, #tpu.memory_space<vmem>>, vector<8x128xf32>
    tpu.vector_store %arg5[%c0_31, %c0_32], %66 {strides = array<i32>} : memref<8x128xf32, #tpu.memory_space<vmem>>, vector<8x128xf32>,
    return
  }
  func.func @transform_0(%arg0: i32, %arg1: i32) -> (i32, i32) {
    %c0_i32 = arith.constant 0 : i32
    %c0_i32_0 = arith.constant 0 : i32
    return %arg0, %c0_i32 : i32, i32
  }
  func.func @transform_1(%arg0: i32, %arg1: i32) -> (i32, i32) {
    %c0_i32 = arith.constant 0 : i32
    %c0_i32_0 = arith.constant 0 : i32
    return %c0_i32, %arg1 : i32, i32
  }
  func.func @transform_2(%arg0: i32, %arg1: i32) -> (i32, i32) {
    %c0_i32 = arith.constant 0 : i32
    return %arg0, %arg1 : i32, i32
  }
  func.func @transform_3(%arg0: i32, %arg1: i32) -> (i32, i32) {
    %c0_i32 = arith.constant 0 : i32
    return %arg0, %arg1 : i32, i32
  }
}

</mosaic_0001>

<bundles_post_ra>
// kernel: tpu_custom_call.1
= control target key start
LH: loop header
LB: loop body
LE: loop exit
PB: predicated region body
PF: predicated region fallthrough
CT: control target
= control target key end

     0   :  { %9 = vsyncpa [#allocation5], 0  ;;  %s379_s0 = inlined_call_operand.hbm [shape: f32[8,32], index: 0, kind: input, shape index: {}]   ;;  %s380_s1 = inlined_call_operand.hbm [shape: f32[32,128], index: 1, kind: input, shape index: {}]   ;;  %s381_s2 = inlined_call_operand.hbm [shape: f32[8,128], index: 2, kind: output, shape index: {0}]   ;;  %s382_s3 = inlined_call_operand.hbm [shape: f32[8,128], index: 3, kind: output, shape index: {1}]  }
   0x1   :  { %10 = vsyncpa [#allocation8], 0 }
   0x2   :  { %11 = vsyncpa [#allocation6], 0 }
   0x3   :  { %12 = vsyncpa [#allocation11], 0  ;;  %s18_s14 = sshll.u32 %s379_s0, 4  ;;  %s330_s15 = smov [#allocation4]   ;;  %s19_s14 = int_to_ptr.hbm [resolvable:$true] %s18_s14 }
   0x4   :  { %s20_s16 = sshll.u32 %s330_s15, 4  ;;  %s28_s19 = sshll.u32 %s380_s1, 4  ;;  %s21_s16 = int_to_ptr.vmem [resolvable:$true] %s20_s16  ;;  %s29_s19 = int_to_ptr.hbm [resolvable:$true] %s28_s19 }
   0x5   :  { %23 = dma.hbm_to_vmem [thread:$0]  %s19_s14, 128, %s21_s16, [#allocation5]  }
   0x6   :  { %s331_s20 = smov [#allocation7]   ;;  %s332_s22 = smov 128  }
   0x7   :  { %s30_s21 = sshll.u32 %s331_s20, 4  ;;  %s333_s23 = smov 8   ;;  %s31_s21 = int_to_ptr.vmem [resolvable:$true] %s30_s21 }
   0x8   :  { %36 = dma.hbm_to_vmem [thread:$0]  %s29_s19, 512, %s31_s21, [#allocation8], %s332_s22, %s332_s22, %s333_s23  }
   0x9   :  { %322 = dma.done.wait [#allocation5], 128  }
   0xa   :  { %323 = vsyncadd [#allocation5], 4294967168 }
   0xb   :  { %324 = dma.done.wait [#allocation8], 512  }
   0xc   :  { %325 = vsyncadd [#allocation8], 4294966784  ;;  %v49_v0 = vld [vmem:[#allocation4] sm:$0xff]  ;;  %vm51_vm0 = vcmask 261120   ;;  %v82_v4 = vld [vmem:[#allocation7 + $0x10] sm:$0xff]  ;;  %v334_v12 = vmov 0  }
   0xd   :  { %v50_v1 = vmul.f32 %v49_v0, %v49_v0  ;;  %v83_v3 = vld [vmem:[#allocation7 + $0x18] sm:$0xff]  ;;  %v81_v5 = vld [vmem:[#allocation7 + $0x8] sm:$0xff]  ;;  %v80_v6 = vld [vmem:[#allocation7] sm:$0xff]  ;;  %v86_v7 = vmul.f32 %v82_v4, %v82_v4  ;;  %220 = vset.pattern.permute.xlu0 %v334_v12  ;;  %221 = vset.pattern.permute.xlu1 %v334_v12  ;;  %vm67_vm2 = vcmask 7168   ;;  %s335_s0 = smov [#allocation9]   ;;  %s182_s26 = sshll.u32 %s381_s2, 4  ;;  %s183_s26 = int_to_ptr.hbm [resolvable:$true] %s182_s26 }
   0xe   :  { %124 = vmatpush.msra.mxu0 %v83_v3  ;;  %v85_v8 = vmul.f32 %v81_v5, %v81_v5  ;;  %v84_v9 = vmul.f32 %v80_v6, %v80_v6  ;;  %v87_v10 = vmul.f32 %v83_v3, %v83_v3  ;;  %s180_s1 = sshll.u32 %s335_s0, 4  ;;  %v336_v48 = vmov 0.0   ;;  %s338_s2 = smov [#allocation10]   ;;  %s181_s1 = int_to_ptr.vmem [resolvable:$true] %s180_s1 }
   0xf   :  { %v52_v2 = vsel %vm51_vm0, %v50_v1, 0.0  ;;  %v337_v63 = vmov 1.0   ;;  %s191_s27 = sshll.u32 %s338_s2, 4  ;;  %s193_s30 = sshll.u32 %s382_s3, 4  ;;  %s192_s27 = int_to_ptr.vmem [resolvable:$true] %s191_s27  ;;  %s194_s30 = int_to_ptr.hbm [resolvable:$true] %s193_s30 }
  0x10   :  { %53 = vadd.xlane.f32.xlu0 %v52_v2  ;;  %125 = vmatpush.msra.mxu0 %v82_v4  ;;  %v88_v11 = vadd.f32 %v85_v8, %v84_v9 }
  0x12   :  { %126 = vmatpush.msra.mxu0 %v81_v5  ;;  %v89_v13 = vadd.f32 %v88_v11, %v86_v7 }
  0x14   :  { %127 = vmatpush.msra.mxu0 %v80_v6  ;;  %v90_v14 = vadd.f32 %v89_v13, %v87_v10 }
  0x15   :  { %209 = vmatmul.msk.f32.vlgmr.msra.gmra.mxu0 %vm51_vm0, %v49_v0 }
  0x16   :  { %v91_v29 = vrot.slane %v90_v14, 4 }
  0x18   :  { %v92_v30 = vadd.f32 %v91_v29, %v90_v14 }
  0x1a   :  { %v93_v31 = vrot.slane %v92_v30, 2 }
  0x1c   :  { %v94_v32 = vadd.f32 %v93_v31, %v92_v30 }
  0x1e   :  { %v95_v33 = vrot.slane %v94_v32, 1 }
  0x20   :  { %v96_v34 = vadd.f32 %v95_v33, %v94_v32 }
  0x22   :  { %vm103_vm7 = vweird.f32 %v96_v34 }
  0x83   :  { %v54_v15 = vpop.xlane.xlu0 %53 }
  0x84   :  { %222 = vrsqrt.f32 %v54_v15  ;;  %vm75_vm3 = vweird.f32 %v54_v15  ;;  %vm62_vm5 = vcmp.eq.f32.partialorder %v54_v15, inf  ;;  %v65_v24 = vand.u32 2147483648, %v54_v15 }
  0x85   :  { %vm64_vm6 = vcmp.eq.f32.partialorder %v54_v15, 0.0  ;;  %224 = vrsqrt.f32 %v96_v34 }
  0x8a   :  { %v223_v16 = vpop.eup %222 }
  0x8b   :  { %v56_v17 = vmul.f32 %v223_v16, %v54_v15  ;;  %vm76_vm1 = vweird.f32 %v223_v16  ;;  %v225_v35 = vpop.eup %224 }
  0x8c   :  { %vm77_vm4 = vmor %vm75_vm3, %vm76_vm1  ;;  %v98_v36 = vmul.f32 %v225_v35, %v96_v34  ;;  %vm104_vm8 = vweird.f32 %v225_v35 }
  0x8d   :  { %v57_v18 = vmul.f32 %v223_v16, %v56_v17  ;;  %vm105_vm9 = vmor %vm103_vm7, %vm104_vm8 }
  0x8e   :  { %v99_v37 = vmul.f32 %v225_v35, %v98_v36 }
  0x8f   :  { %v58_v19 = vmul.f32 0.5, %v57_v18 }
  0x90   :  { %v100_v38 = vmul.f32 0.5, %v99_v37 }
  0x91   :  { %v59_v20 = vsub.f32 1.5, %v58_v19 }
  0x92   :  { %v101_v39 = vsub.f32 1.5, %v100_v38  ;;  %v129_v41 = vpop.f32.mrf.mxu0 }
  0x93   :  { %v60_v21 = vmul.f32 %v223_v16, %v59_v20 }
  0x94   :  { %v102_v40 = vmul.f32 %v225_v35, %v101_v39 }
  0x95   :  { %v61_v22 = vmul.f32 %v60_v21, %v54_v15  ;;  %v78_v23 = vsel %vm77_vm4, %v223_v16, %v60_v21 }
  0x96   :  { %79 = vst.msk [vmem:[#allocation3] sm:$0xff] %vm67_vm2, %v78_v23  ;;  %v106_v42 = vsel %vm105_vm9, %v225_v35, %v102_v40 }
  0x97   :  { %v63_v25 = vsel %vm62_vm5, %v54_v15, %v61_v22 }
  0x98   :  { %v66_v26 = vsel %vm64_vm6, %v65_v24, %v63_v25 }
  0x99   :  { %68 = vst.msk [vmem:[#allocation2] sm:$0xff] %vm67_vm2, %v66_v26 }
  0x9d   :  { %v132_v27 = vld [vmem:[#allocation3] sm:$0xff] }
  0x9e   :  { %135 = vperm.xlu0 %220, %v132_v27  }
  0xa0   :  { %v165_v28 = vld [vmem:[#allocation2] sm:$0xff] }
  0xa1   :  { %168 = vperm.xlu1 %221, %v165_v28  }
 0x110   :  { %v136_v43 = vpop.permute.xlu0 %135 }
 0x111   :  { %v138_v44 = vmul.f32 %v136_v43, %v129_v41 }
 0x113   :  { %v139_v45 = vmul.f32 %v138_v44, %v106_v42  ;;  %v169_v51 = vpop.permute.xlu1 %168 }
 0x115   :  { %v210_v46 = vclamps-f32 %v139_v45, 1.0 }
 0x117   :  { %v142_v47 = vmul.f32 %v210_v46, %v210_v46  ;;  %vm147_vm10 = vcmp.le.f32.partialorder %v210_v46, 0.70710677  ;;  %vm148_vm11 = vcmp.le.f32.partialorder %v210_v46, 1.7948966e-09  ;;  %vm149_vm12 = vcmp.le.f32.partialorder %v210_v46, -0.70710677 }
 0x118   :  { %vm150_vm13 = vcmp.le.f32.partialorder %v210_v46, -1.0  ;;  %v151_v49 = vsel %vm147_vm10, 1.0, %v336_v48  ;;  %v152_v50 = vsel %vm148_vm11, 1.0, %v336_v48  ;;  %vm368_vm14 = vmxor %vm147_vm10, %vm148_vm11  ;;  %v171_v55 = vmul.f32 %v210_v46, %v169_v51 }
 0x119   :  { %v143_v52 = vmul.f32 8.0, %v142_v47  ;;  %v153_v53 = vadd.f32 %v152_v50, %v151_v49  ;;  %v154_v56 = vsel %vm149_vm12, 1.0, %v336_v48  ;;  %vm159_vm15 = vmxor %vm149_vm12, %vm150_vm13  ;;  %v156_v59 = vsel %vm150_vm13, 1.0, %v336_v48 }
 0x11a   :  { %172 = vst [vmem:[#allocation9] sm:$0xff] %v171_v55  ;;  %vm160_vm0 = vmxor %vm368_vm14, %vm159_vm15 }
 0x11b   :  { %v144_v57 = vmul.f32 %v143_v52, %v142_v47  ;;  %v155_v58 = vadd.f32 %v154_v56, %v153_v53  ;;  %185 = dma.vmem_to_hbm [thread:$0]  %s181_s1, 128, %s183_s26, [#allocation6]   ;;  %v161_v0 = vsel %vm160_vm0, -1.0, %v337_v63 }
 0x11d   :  { %v145_v60 = vsub.f32 %v144_v57, %v143_v52  ;;  %v157_v61 = vadd.f32 %v156_v59, %v155_v58 }
 0x11f   :  { %v146_v62 = vadd.f32 1.0, %v145_v60  ;;  %v163_v2 = vmul.f32 2.0, %v157_v61 }
 0x121   :  { %v162_v1 = vmul.f32 %v161_v0, %v146_v62 }
 0x123   :  { %v164_v3 = vsub.f32 %v162_v1, %v163_v2 }
 0x125   :  { %v173_v4 = vmul.f32 %v169_v51, %v164_v3 }
 0x127   :  { %174 = vst [vmem:[#allocation10] sm:$0xff] %v173_v4 }
 0x128   :  { %196 = dma.vmem_to_hbm [thread:$0]  %s192_s27, 128, %s194_s30, [#allocation11]  }
 0x129   :  { %326 = dma.done.wait [#allocation6], 128  }
 0x12a   :  { %327 = vsyncadd [#allocation6], 4294967168 }
 0x12b   :  { %328 = dma.done.wait [#allocation11], 128  }
 0x12c   :  { %329 = vsyncadd [#allocation11], 4294967168 }
 0x12d   :  { %205 = vsyncpa [#allocation5], 1 }
 0x12e   :  { %206 = vsyncpa [#allocation8], 1 }
 0x12f   :  { %207 = vsyncpa [#allocation6], 1 }
 0x130   :  { %208 = vsyncpa [#allocation11], 1 }

</bundles_post_ra>
